<compile_context>
chip_gen: v5e
topology: v5e:2x2
jax: 0.10.0
libtpu: 0.0.40
codegen_flags: <defaults>
</compile_context>

<pallas_src>
import jax
import jax.numpy as jnp
from jax.experimental import pallas as pl
from jax.experimental.pallas import tpu as pltpu


HIDDEN = 128  # fixed by the PyTorch module (fc1 = Linear(input_dim, 128))


def _round_up(n: int, m: int) -> int:
    return (n + m - 1) // m * m


def _mlp_kernel(x_ref, w1_ref, b1_ref, w2_ref, b2_ref, o_ref):
    # Cast the streamed f32 tile to bf16 in-register (free: mem-bound kernel).
    x = x_ref[...].astype(jnp.bfloat16)
    # fc1 on the MXU: bf16 operands, f32 accumulation.
    h = jnp.dot(x, w1_ref[...], preferred_element_type=jnp.float32)
    # bias + ReLU epilogue in f32 (VPU; v5e has no bf16 ALUs).
    h = jnp.maximum(h + b1_ref[...], 0.0)
    # fc2: cast activations to bf16 only at the MXU input, accumulate in f32.
    y = jnp.dot(h.astype(jnp.bfloat16), w2_ref[...],
                preferred_element_type=jnp.float32)
    o_ref[...] = (y + b2_ref[...]).astype(o_ref.dtype)


def _choose_tm(B, D, C, tm_cap=None, vmem_budget_bytes=24 << 20):
    """Balanced, VMEM-budget-driven batch tile (multiple of 16, >= 8)."""
    # Double-buffered f32 x rows in + f32 output rows back, per batch row.
    per_row = 2 * 4 * D + 2 * 4 * C
    cap = int(min(vmem_budget_bytes // max(per_row, 1), 4096))
    if tm_cap is not None:
        cap = min(cap, int(tm_cap))
    cap = max(16, (cap // 16) * 16)
    n_tiles = max(1, -(-B // cap))          # ceil(B / cap)
    tm = _round_up(-(-B // n_tiles), 16)    # balanced tiles, 16-row granule
    tm = min(tm, _round_up(B, 8))           # don't exceed (rounded) batch
    return max(8, tm)


def mlp_leaf_forward(x, w1, b1, w2, b2, *, tm=None):
    """x: (B, input_dim); w1: (input_dim, 128); b1: (128,) or (1, 128);
    w2: (128, num_classes); b2: (num_classes,) or (1, num_classes)
    -> (B, num_classes) float32."""
    B, D = x.shape
    H = w1.shape[1]
    C = w2.shape[1]
    assert H == HIDDEN and w2.shape[0] == HIDDEN

    # Only the tiny resident operands are cast/reshaped in the wrapper.
    w1_b = w1.astype(jnp.bfloat16)
    w2_b = w2.astype(jnp.bfloat16)
    b1_f = jnp.asarray(b1, jnp.float32).reshape(1, H)
    b2_f = jnp.asarray(b2, jnp.float32).reshape(1, C)

    TM = _choose_tm(B, D, C, tm_cap=tm)
    grid = (pl.cdiv(B, TM),)

    # VMEM need: double-buffered x/out tiles + (double-buffered) weights +
    # slack.  Floor at 32 MiB (raises v5e's 16-MiB scoped default), cap 100 MiB.
    need = (2 * (TM * D * 4 + TM * C * 4)
            + 2 * ((D * H + H * C) * 2 + (H + C) * 4)
            + (2 << 20))
    vmem_limit = int(min(max(need, 32 << 20), 100 << 20))

    in_specs = [
        # streamed x tile at native dtype/width (last dim == full array dim)
        pl.BlockSpec((TM, D), lambda i: (i, 0)),
        # resident weights / biases: constant index_map => DMA'd once, reused
        pl.BlockSpec((D, H), lambda i: (0, 0)),
        pl.BlockSpec((1, H), lambda i: (0, 0)),
        pl.BlockSpec((H, C), lambda i: (0, 0)),
        pl.BlockSpec((1, C), lambda i: (0, 0)),
    ]
    out_spec = pl.BlockSpec((TM, C), lambda i: (i, 0))
    out_shape = jax.ShapeDtypeStruct((B, C), jnp.float32)

    def _call(core_parallel):
        sem = (pltpu.CORE_PARALLEL,) if core_parallel else ("parallel",)
        return pl.pallas_call(
            _mlp_kernel,
            out_shape=out_shape,
            grid_spec=pltpu.PrefetchScalarGridSpec(
                num_scalar_prefetch=0,
                grid=grid,
                in_specs=in_specs,
                out_specs=out_spec,
            ),
            compiler_params=pltpu.CompilerParams(
                dimension_semantics=sem,
                vmem_limit_bytes=vmem_limit,
            ),
        )(x, w1_b, b1_f, w2_b, b2_f)

    try:
        # v7x: shard the batch grid across both TensorCores.
        return _call(core_parallel=True)
    except Exception:  # single-core / backends without CORE_PARALLEL support
        return _call(core_parallel=False)


def init_params(key, input_dim, num_classes, hidden=HIDDEN):
    # Deterministic synthetic init (matches PyTorch Linear's uniform range).
    k1, k2, k3, k4 = jax.random.split(key, 4)
    bound1 = 1.0 / (input_dim ** 0.5)
    bound2 = 1.0 / (hidden ** 0.5)
    w1 = jax.random.uniform(k1, (input_dim, hidden), jnp.float32, -bound1, bound1)
    b1 = jax.random.uniform(k2, (1, hidden), jnp.float32, -bound1, bound1)
    w2 = jax.random.uniform(k3, (hidden, num_classes), jnp.float32, -bound2, bound2)
    b2 = jax.random.uniform(k4, (1, num_classes), jnp.float32, -bound2, bound2)
    return w1, b1, w2, b2


if __name__ == "__main__":
    key = jax.random.PRNGKey(0)
    batch, input_dim, num_classes = 8, 32, 16
    kx, kx2, kp = jax.random.split(key, 3)
    x = jax.random.normal(kx, (batch, input_dim), jnp.float32)
    w1, b1, w2, b2 = init_params(kp, input_dim, num_classes)

    # Single-tile check. bf16 MXU operands -> loosened tolerance vs f32 ref.
    out = jax.block_until_ready(mlp_leaf_forward(x, w1, b1, w2, b2))
    ref = jnp.maximum(x @ w1 + b1, 0.0) @ w2 + b2
    assert out.shape == (batch, num_classes)
    assert jnp.allclose(out, ref, atol=3e-2, rtol=3e-2)

    # Multi-tile check exercising the batch grid and the clipped final tile
    # (B=40 is not a multiple of TM=16; no batch padding is materialized).
    batch2 = 40
    x2 = jax.random.normal(kx2, (batch2, input_dim), jnp.float32)
    out2 = jax.block_until_ready(mlp_leaf_forward(x2, w1, b1, w2, b2, tm=16))
    ref2 = jnp.maximum(x2 @ w1 + b1, 0.0) @ w2 + b2
    assert out2.shape == (batch2, num_classes)
    assert jnp.allclose(out2, ref2, atol=3e-2, rtol=3e-2)

    print("KERNEL_OK")
</pallas_src>

<mosaic_0001>
module attributes {stable_mosaic.version = 11 : i64} {
  func.func @_mlp_kernel(%arg0: i32, %arg1: memref<8x32xf32, #tpu.memory_space<vmem>>, %arg2: memref<32x128xbf16, #tpu.memory_space<vmem>>, %arg3: memref<1x128xf32, #tpu.memory_space<vmem>>, %arg4: memref<128x16xbf16, #tpu.memory_space<vmem>>, %arg5: memref<1x16xf32, #tpu.memory_space<vmem>>, %arg6: memref<8x16xf32, #tpu.memory_space<vmem>>) attributes {dimension_semantics = [#tpu.dimension_semantics<core_parallel>], iteration_bounds = array<i64: 1>, scalar_prefetch = 0 : i64, scratch_operands = 0 : i64, tpu.core_type = #tpu.core_type<tc>, window_params = [{transform_indices = @transform_0, window_bounds = array<i64: 8, 32>}, {pipeline_mode = #tpu.pipeline_mode<synchronous>, transform_indices = @transform_1, window_bounds = array<i64: 32, 128>}, {pipeline_mode = #tpu.pipeline_mode<synchronous>, transform_indices = @transform_2, window_bounds = array<i64: 1, 128>}, {pipeline_mode = #tpu.pipeline_mode<synchronous>, transform_indices = @transform_3, window_bounds = array<i64: 128, 16>}, {pipeline_mode = #tpu.pipeline_mode<synchronous>, transform_indices = @transform_4, window_bounds = array<i64: 1, 16>}, {transform_indices = @transform_5, window_bounds = array<i64: 8, 16>}]} {
    %c0 = arith.constant 0 : index
    %c0_0 = arith.constant 0 : index
    %0 = vector.load %arg1[%c0, %c0_0] : memref<8x32xf32, #tpu.memory_space<vmem>>, vector<8x32xf32>
    %1 = arith.truncf %0 : vector<8x32xf32> to vector<8x32xbf16>
    %c0_1 = arith.constant 0 : index
    %c0_2 = arith.constant 0 : index
    %2 = vector.load %arg2[%c0_1, %c0_2] : memref<32x128xbf16, #tpu.memory_space<vmem>>, vector<32x128xbf16>
    %cst = arith.constant dense<0.000000e+00> : vector<8x128xf32>
    %3 = tpu.matmul %1, %2, %cst {dimension_numbers = #tpu.dot_dimension_numbers<[1], [0], [0], [1], [0, 0, 1, 1], [], []>} : vector<8x32xbf16>, vector<32x128xbf16>, vector<8x128xf32> -> vector<8x128xf32>
    %c0_3 = arith.constant 0 : index
    %c0_4 = arith.constant 0 : index
    %4 = vector.load %arg3[%c0_3, %c0_4] : memref<1x128xf32, #tpu.memory_space<vmem>>, vector<1x128xf32>
    %5 = vector.broadcast %4 : vector<1x128xf32> to vector<8x128xf32>
    %6 = arith.addf %3, %5 : vector<8x128xf32>
    %cst_5 = arith.constant 0.000000e+00 : f32
    %7 = vector.broadcast %cst_5 : f32 to vector<8x128xf32>
    %8 = arith.maximumf %6, %7 : vector<8x128xf32>
    %9 = arith.truncf %8 : vector<8x128xf32> to vector<8x128xbf16>
    %c0_6 = arith.constant 0 : index
    %c0_7 = arith.constant 0 : index
    %10 = vector.load %arg4[%c0_6, %c0_7] : memref<128x16xbf16, #tpu.memory_space<vmem>>, vector<128x16xbf16>
    %cst_8 = arith.constant dense<0.000000e+00> : vector<8x16xf32>
    %11 = tpu.matmul %9, %10, %cst_8 {dimension_numbers = #tpu.dot_dimension_numbers<[1], [0], [0], [1], [0, 0, 1, 1], [], []>} : vector<8x128xbf16>, vector<128x16xbf16>, vector<8x16xf32> -> vector<8x16xf32>
    %c0_9 = arith.constant 0 : index
    %c0_10 = arith.constant 0 : index
    %12 = vector.load %arg5[%c0_9, %c0_10] : memref<1x16xf32, #tpu.memory_space<vmem>>, vector<1x16xf32>
    %13 = vector.broadcast %12 : vector<1x16xf32> to vector<8x16xf32>
    %14 = arith.addf %11, %13 : vector<8x16xf32>
    %c0_11 = arith.constant 0 : index
    %c0_12 = arith.constant 0 : index
    %15 = vector.load %arg6[%c0_11, %c0_12] : memref<8x16xf32, #tpu.memory_space<vmem>>, vector<8x16xf32>
    tpu.vector_store %arg6[%c0_11, %c0_12], %14 {strides = array<i32>} : memref<8x16xf32, #tpu.memory_space<vmem>>, vector<8x16xf32>,
    return
  }
  func.func @transform_0(%arg0: i32) -> (i32, i32) {
    %c0_i32 = arith.constant 0 : i32
    %c0_i32_0 = arith.constant 0 : i32
    return %arg0, %c0_i32 : i32, i32
  }
  func.func @transform_1(%arg0: i32) -> (i32, i32) {
    %c0_i32 = arith.constant 0 : i32
    %c0_i32_0 = arith.constant 0 : i32
    %c0_i32_1 = arith.constant 0 : i32
    return %c0_i32, %c0_i32_0 : i32, i32
  }
  func.func @transform_2(%arg0: i32) -> (i32, i32) {
    %c0_i32 = arith.constant 0 : i32
    %c0_i32_0 = arith.constant 0 : i32
    %c0_i32_1 = arith.constant 0 : i32
    return %c0_i32, %c0_i32_0 : i32, i32
  }
  func.func @transform_3(%arg0: i32) -> (i32, i32) {
    %c0_i32 = arith.constant 0 : i32
    %c0_i32_0 = arith.constant 0 : i32
    %c0_i32_1 = arith.constant 0 : i32
    return %c0_i32, %c0_i32_0 : i32, i32
  }
  func.func @transform_4(%arg0: i32) -> (i32, i32) {
    %c0_i32 = arith.constant 0 : i32
    %c0_i32_0 = arith.constant 0 : i32
    %c0_i32_1 = arith.constant 0 : i32
    return %c0_i32, %c0_i32_0 : i32, i32
  }
  func.func @transform_5(%arg0: i32) -> (i32, i32) {
    %c0_i32 = arith.constant 0 : i32
    %c0_i32_0 = arith.constant 0 : i32
    return %arg0, %c0_i32 : i32, i32
  }
}

module attributes {stable_mosaic.version = 11 : i64} {
  func.func @_mlp_kernel(%arg0: i32, %arg1: memref<8x32xf32, #tpu.memory_space<vmem>>, %arg2: memref<32x128xbf16, #tpu.memory_space<vmem>>, %arg3: memref<1x128xf32, #tpu.memory_space<vmem>>, %arg4: memref<128x16xbf16, #tpu.memory_space<vmem>>, %arg5: memref<1x16xf32, #tpu.memory_space<vmem>>, %arg6: memref<8x16xf32, #tpu.memory_space<vmem>>) attributes {dimension_semantics = [#tpu.dimension_semantics<parallel>], iteration_bounds = array<i64: 1>, scalar_prefetch = 0 : i64, scratch_operands = 0 : i64, tpu.core_type = #tpu.core_type<tc>, window_params = [{transform_indices = @transform_0, window_bounds = array<i64: 8, 32>}, {pipeline_mode = #tpu.pipeline_mode<synchronous>, transform_indices = @transform_1, window_bounds = array<i64: 32, 128>}, {pipeline_mode = #tpu.pipeline_mode<synchronous>, transform_indices = @transform_2, window_bounds = array<i64: 1, 128>}, {pipeline_mode = #tpu.pipeline_mode<synchronous>, transform_indices = @transform_3, window_bounds = array<i64: 128, 16>}, {pipeline_mode = #tpu.pipeline_mode<synchronous>, transform_indices = @transform_4, window_bounds = array<i64: 1, 16>}, {transform_indices = @transform_5, window_bounds = array<i64: 8, 16>}]} {
    %c0 = arith.constant 0 : index
    %c0_0 = arith.constant 0 : index
    %0 = vector.load %arg1[%c0, %c0_0] : memref<8x32xf32, #tpu.memory_space<vmem>>, vector<8x32xf32>
    %1 = arith.truncf %0 : vector<8x32xf32> to vector<8x32xbf16>
    %c0_1 = arith.constant 0 : index
    %c0_2 = arith.constant 0 : index
    %2 = vector.load %arg2[%c0_1, %c0_2] : memref<32x128xbf16, #tpu.memory_space<vmem>>, vector<32x128xbf16>
    %cst = arith.constant dense<0.000000e+00> : vector<8x128xf32>
    %3 = tpu.matmul %1, %2, %cst {dimension_numbers = #tpu.dot_dimension_numbers<[1], [0], [0], [1], [0, 0, 1, 1], [], []>} : vector<8x32xbf16>, vector<32x128xbf16>, vector<8x128xf32> -> vector<8x128xf32>
    %c0_3 = arith.constant 0 : index
    %c0_4 = arith.constant 0 : index
    %4 = vector.load %arg3[%c0_3, %c0_4] : memref<1x128xf32, #tpu.memory_space<vmem>>, vector<1x128xf32>
    %5 = vector.broadcast %4 : vector<1x128xf32> to vector<8x128xf32>
    %6 = arith.addf %3, %5 : vector<8x128xf32>
    %cst_5 = arith.constant 0.000000e+00 : f32
    %7 = vector.broadcast %cst_5 : f32 to vector<8x128xf32>
    %8 = arith.maximumf %6, %7 : vector<8x128xf32>
    %9 = arith.truncf %8 : vector<8x128xf32> to vector<8x128xbf16>
    %c0_6 = arith.constant 0 : index
    %c0_7 = arith.constant 0 : index
    %10 = vector.load %arg4[%c0_6, %c0_7] : memref<128x16xbf16, #tpu.memory_space<vmem>>, vector<128x16xbf16>
    %cst_8 = arith.constant dense<0.000000e+00> : vector<8x16xf32>
    %11 = tpu.matmul %9, %10, %cst_8 {dimension_numbers = #tpu.dot_dimension_numbers<[1], [0], [0], [1], [0, 0, 1, 1], [], []>} : vector<8x128xbf16>, vector<128x16xbf16>, vector<8x16xf32> -> vector<8x16xf32>
    %c0_9 = arith.constant 0 : index
    %c0_10 = arith.constant 0 : index
    %12 = vector.load %arg5[%c0_9, %c0_10] : memref<1x16xf32, #tpu.memory_space<vmem>>, vector<1x16xf32>
    %13 = vector.broadcast %12 : vector<1x16xf32> to vector<8x16xf32>
    %14 = arith.addf %11, %13 : vector<8x16xf32>
    %c0_11 = arith.constant 0 : index
    %c0_12 = arith.constant 0 : index
    %15 = vector.load %arg6[%c0_11, %c0_12] : memref<8x16xf32, #tpu.memory_space<vmem>>, vector<8x16xf32>
    tpu.vector_store %arg6[%c0_11, %c0_12], %14 {strides = array<i32>} : memref<8x16xf32, #tpu.memory_space<vmem>>, vector<8x16xf32>,
    return
  }
  func.func @transform_0(%arg0: i32) -> (i32, i32) {
    %c0_i32 = arith.constant 0 : i32
    %c0_i32_0 = arith.constant 0 : i32
    return %arg0, %c0_i32 : i32, i32
  }
  func.func @transform_1(%arg0: i32) -> (i32, i32) {
    %c0_i32 = arith.constant 0 : i32
    %c0_i32_0 = arith.constant 0 : i32
    %c0_i32_1 = arith.constant 0 : i32
    return %c0_i32, %c0_i32_0 : i32, i32
  }
  func.func @transform_2(%arg0: i32) -> (i32, i32) {
    %c0_i32 = arith.constant 0 : i32
    %c0_i32_0 = arith.constant 0 : i32
    %c0_i32_1 = arith.constant 0 : i32
    return %c0_i32, %c0_i32_0 : i32, i32
  }
  func.func @transform_3(%arg0: i32) -> (i32, i32) {
    %c0_i32 = arith.constant 0 : i32
    %c0_i32_0 = arith.constant 0 : i32
    %c0_i32_1 = arith.constant 0 : i32
    return %c0_i32, %c0_i32_0 : i32, i32
  }
  func.func @transform_4(%arg0: i32) -> (i32, i32) {
    %c0_i32 = arith.constant 0 : i32
    %c0_i32_0 = arith.constant 0 : i32
    %c0_i32_1 = arith.constant 0 : i32
    return %c0_i32, %c0_i32_0 : i32, i32
  }
  func.func @transform_5(%arg0: i32) -> (i32, i32) {
    %c0_i32 = arith.constant 0 : i32
    %c0_i32_0 = arith.constant 0 : i32
    return %arg0, %c0_i32 : i32, i32
  }
}

</mosaic_0001>

<bundles_post_ra>
// kernel: tpu_custom_call.1
= control target key start
LH: loop header
LB: loop body
LE: loop exit
PB: predicated region body
PF: predicated region fallthrough
CT: control target
= control target key end

     0   :  { %s297_s18 = sld [smem:[#allocation0]]   ;;  %s345_s0 = inlined_call_operand.vmem [shape: f32[8,32], index: 0, kind: input, shape index: {}]   ;;  %s346_s1 = inlined_call_operand.vmem [shape: bf16[32,128], index: 1, kind: input, shape index: {}]   ;;  %s347_s2 = inlined_call_operand.vmem [shape: f32[1,128], index: 2, kind: input, shape index: {}]   ;;  %s348_s3 = inlined_call_operand.vmem [shape: bf16[128,16], index: 3, kind: input, shape index: {}]   ;;  %s349_s4 = inlined_call_operand.vmem [shape: f32[1,16], index: 4, kind: input, shape index: {}]   ;;  %s350_s5 = inlined_call_operand.hbm [shape: f32[8,16], index: 5, kind: output, shape index: {}]  }
   0x1   :  { %v228_v0 = vld [vmem:[%s346_s1 + $0x8] sm:$0xff]  ;;  %v236_v1 = vld [vmem:[%s348_s3 + $0x38] sm:$0xff]  ;;  %v227_v2 = vld [vmem:[%s346_s1] sm:$0xff] }
   0x2   :  { %66 = vmatpush.bf16.msra.mxu0 %v228_v0  ;;  %143 = vmatpush.bf16.msra.mxu1 %v236_v1  ;;  %v235_v3 = vld [vmem:[%s348_s3 + $0x30] sm:$0xff] }
   0x3   :  { %10 = vsyncpa [#allocation3], 0  ;;  %v34_v4 = vld [vmem:[%s345_s0] sm:$0xff]  ;;  %vm56_vm0 = vcmask 261120   ;;  %v234_v6 = vld [vmem:[%s348_s3 + $0x28] sm:$0xff]  ;;  %vm156_vm1 = vcmask 130048  }
   0x4   :  { %v35_v5 = vpack.c.bf16 %v34_v4, %v34_v4  ;;  %v233_v7 = vld [vmem:[%s348_s3 + $0x20] sm:$0xff]  ;;  %v232_v8 = vld [vmem:[%s348_s3 + $0x18] sm:$0xff]  ;;  %v231_v9 = vld [vmem:[%s348_s3 + $0x10] sm:$0xff]  ;;  %s256_s27 = scalar_lea.hbm %s350_s5, 8 }
   0x5   :  { %v230_v10 = vld [vmem:[%s348_s3 + $0x8] sm:$0xff]  ;;  %v229_v11 = vld [vmem:[%s348_s3] sm:$0xff]  ;;  %s266_s3 = smov [#allocation2]  }
   0x6   :  { %67 = vmatpush.bf16.msra.mxu0 %v227_v2  ;;  %144 = vmatpush.bf16.msra.mxu1 %v235_v3  ;;  %v238_v12 = vld [vmem:[%s347_s2] ss:$0 sm:$0xff]  ;;  %s226_s16 = sshll.u32 %s297_s18, 3  ;;  %s165_s23 = sshll.u32 %s266_s3, 4  ;;  %s166_s23 = int_to_ptr.vmem [resolvable:$true] %s165_s23 }
   0x7   :  { %s163_s20 = scalar_lea.hbm %s350_s5, %s226_s16  ;;  %v239_v18 = vld [vmem:[%s349_s4] ss:$0 sm:$0xff] }
   0x8   :  { %s167_s24 = sshll.u32 %s163_s20, 4  ;;  %s168_s24 = int_to_ptr.hbm [resolvable:$true] %s167_s24 }
   0x9   :  { %193 = vmatmul.msk.bf16.vlgmr.msra.gmra.mxu0 %vm56_vm0, %v35_v5  ;;  %s252_s2 = sshra.s32 %s168_s24, 4  ;;  %s253_s2 = int_to_ptr.hbm [resolvable:$true] %s252_s2 }
   0xa   :  { %145 = vmatpush.bf16.msra.mxu1 %v234_v6  ;;  %s254_s18 = scalar_lea.hbm %s253_s2, 8 }
   0xb   :  { %p255_p0 = scmp.ne.s32.totalorder %s253_s2, %s254_s18  ;;  %p258_p1 = scmp.lt.s32.totalorder %s256_s27, %s254_s18 }
   0xd   :  { %p260_p2 = pnand %p258_p1, %p255_p0 }
   0xe   :  { %146 = vmatpush.bf16.msra.mxu1 %v233_v7 }
  0x12   :  { %147 = vmatpush.bf16.msra.mxu1 %v232_v8 }
  0x16   :  { %148 = vmatpush.bf16.msra.mxu1 %v231_v9 }
  0x1a   :  { %149 = vmatpush.bf16.msra.mxu1 %v230_v10 }
  0x1e   :  { %150 = vmatpush.bf16.msra.mxu1 %v229_v11 }
  0x86   :  { %v69_v13 = vpop.f32.mrf.mxu0 }
  0x87   :  { %v70_v14 = vadd.f32 %v238_v12, %v69_v13 }
  0x89   :  { %v73_v15 = vmax.f32 %v70_v14, 0.0 }
  0x8b   :  { %v74_v16 = vpack.c.bf16 %v73_v15, %v73_v15 }
  0x8d   :  { %151 = vmatmul.bf16.vlgmr.msra.gmra.mxu1 %v74_v16 }
  0x8e   :  { %v71_v17 = vpop.f32.mrf.mxu0 }
 0x10a   :  { %v152_v19 = vpop.f32.mrf.mxu1 }
 0x10b   :  { %v153_v20 = vadd.f32 %v239_v18, %v152_v19 }
 0x10d   :  { %157 = vst.msk [vmem:[#allocation2] sm:$0xff] %vm156_vm1, %v153_v20 }
 0x10e   :  { %263 = shalt.err (!%p260_p2)
}
 0x10f   :  { %170 = dma.vmem_to_hbm [thread:$0]  %s166_s23, 128, %s168_s24, [#allocation3]  }
 0x112   :  { %v154_v21 = vpop.f32.mrf.mxu1 }
 0x113   :  { %264 = dma.done.wait [#allocation3], 128  }
 0x114   :  { %265 = vsyncadd [#allocation3], 4294967168 }
 0x115   :  { %175 = vsyncpa [#allocation3], 1 }

// kernel: tpu_custom_call.1
= control target key start
LH: loop header
LB: loop body
LE: loop exit
PB: predicated region body
PF: predicated region fallthrough
CT: control target
= control target key end

     0   :  { %s315_s0 = inlined_call_operand.vmem [shape: f32[8,32], index: 0, kind: input, shape index: {}]   ;;  %s316_s1 = inlined_call_operand.vmem [shape: bf16[32,128], index: 1, kind: input, shape index: {}]   ;;  %s317_s2 = inlined_call_operand.vmem [shape: f32[1,128], index: 2, kind: input, shape index: {}]   ;;  %s318_s3 = inlined_call_operand.vmem [shape: bf16[128,16], index: 3, kind: input, shape index: {}]   ;;  %s319_s4 = inlined_call_operand.vmem [shape: f32[1,16], index: 4, kind: input, shape index: {}]   ;;  %s320_s5 = inlined_call_operand.hbm [shape: f32[8,16], index: 5, kind: output, shape index: {}]  }
   0x1   :  { %v204_v0 = vld [vmem:[%s316_s1 + $0x8] sm:$0xff]  ;;  %v212_v1 = vld [vmem:[%s318_s3 + $0x38] sm:$0xff]  ;;  %v203_v2 = vld [vmem:[%s316_s1] sm:$0xff] }
   0x2   :  { %54 = vmatpush.bf16.msra.mxu0 %v204_v0  ;;  %v22_v3 = vld [vmem:[%s315_s0] sm:$0xff]  ;;  %131 = vmatpush.bf16.msra.mxu1 %v212_v1  ;;  %v211_v4 = vld [vmem:[%s318_s3 + $0x30] sm:$0xff] }
   0x3   :  { %10 = vsyncpa [#allocation3], 0  ;;  %v23_v5 = vpack.c.bf16 %v22_v3, %v22_v3  ;;  %vm44_vm0 = vcmask 261120   ;;  %v210_v6 = vld [vmem:[%s318_s3 + $0x28] sm:$0xff]  ;;  %v209_v7 = vld [vmem:[%s318_s3 + $0x20] sm:$0xff]  ;;  %s242_s17 = smov [#allocation2]  }
   0x4   :  { %v208_v8 = vld [vmem:[%s318_s3 + $0x18] sm:$0xff]  ;;  %v207_v9 = vld [vmem:[%s318_s3 + $0x10] sm:$0xff]  ;;  %v206_v10 = vld [vmem:[%s318_s3 + $0x8] sm:$0xff]  ;;  %s151_s18 = sshll.u32 %s242_s17, 4  ;;  %vm144_vm1 = vcmask 130048   ;;  %s152_s18 = int_to_ptr.vmem [resolvable:$true] %s151_s18 }
   0x5   :  { %v205_v11 = vld [vmem:[%s318_s3] sm:$0xff]  ;;  %s153_s3 = sshll.u32 %s320_s5, 4  ;;  %s154_s3 = int_to_ptr.hbm [resolvable:$true] %s153_s3 }
   0x6   :  { %55 = vmatpush.bf16.msra.mxu0 %v203_v2  ;;  %132 = vmatpush.bf16.msra.mxu1 %v211_v4  ;;  %v214_v12 = vld [vmem:[%s317_s2] ss:$0 sm:$0xff] }
   0x7   :  { %v215_v18 = vld [vmem:[%s319_s4] ss:$0 sm:$0xff] }
   0x9   :  { %170 = vmatmul.msk.bf16.vlgmr.msra.gmra.mxu0 %vm44_vm0, %v23_v5 }
   0xa   :  { %133 = vmatpush.bf16.msra.mxu1 %v210_v6 }
   0xe   :  { %134 = vmatpush.bf16.msra.mxu1 %v209_v7 }
  0x12   :  { %135 = vmatpush.bf16.msra.mxu1 %v208_v8 }
  0x16   :  { %136 = vmatpush.bf16.msra.mxu1 %v207_v9 }
  0x1a   :  { %137 = vmatpush.bf16.msra.mxu1 %v206_v10 }
  0x1e   :  { %138 = vmatpush.bf16.msra.mxu1 %v205_v11 }
  0x86   :  { %v57_v13 = vpop.f32.mrf.mxu0 }
  0x87   :  { %v58_v14 = vadd.f32 %v214_v12, %v57_v13 }
  0x89   :  { %v61_v15 = vmax.f32 %v58_v14, 0.0 }
  0x8b   :  { %v62_v16 = vpack.c.bf16 %v61_v15, %v61_v15 }
  0x8d   :  { %139 = vmatmul.bf16.vlgmr.msra.gmra.mxu1 %v62_v16 }
  0x8e   :  { %v59_v17 = vpop.f32.mrf.mxu0 }
 0x10a   :  { %v140_v19 = vpop.f32.mrf.mxu1 }
 0x10b   :  { %v141_v20 = vadd.f32 %v215_v18, %v140_v19 }
 0x10d   :  { %145 = vst.msk [vmem:[#allocation2] sm:$0xff] %vm144_vm1, %v141_v20 }
 0x10e   :  { %156 = dma.vmem_to_hbm [thread:$0]  %s152_s18, 128, %s154_s3, [#allocation3]  }
 0x112   :  { %v142_v21 = vpop.f32.mrf.mxu1 }
 0x113   :  { %240 = dma.done.wait [#allocation3], 128  }
 0x114   :  { %241 = vsyncadd [#allocation3], 4294967168 }
 0x115   :  { %161 = vsyncpa [#allocation3], 1 }

</bundles_post_ra>
